<compile_context>
chip_gen: v5e
topology: v5e:2x2
jax: 0.10.0
libtpu: 0.0.40
codegen_flags: <defaults>
</compile_context>

<pallas_src>
import functools
import math

import jax
import jax.numpy as jnp
from jax.experimental import pallas as pl
from jax.experimental.pallas import tpu as pltpu


def _make_divisible(v, divisor, min_value=None):
    if min_value is None:
        min_value = divisor
    new_v = max(min_value, int(v + divisor / 2) // divisor * divisor)
    if new_v < 0.9 * v:
        new_v += divisor
    return new_v


def _round_up(v, m):
    return ((v + m - 1) // m) * m


def _sublane_tile(dtype):
    # (sublane, lane) tiling: 8 rows for 4-byte, 16 for 2-byte, 32 for 1-byte.
    return max(8, 32 // jnp.dtype(dtype).itemsize)


def _vmem_capacity_bytes():
    try:
        return int(pltpu.get_tpu_info().vmem_capacity_bytes)
    except Exception:
        return 64 << 20  # conservative: v7x-class per-TensorCore VMEM


def _largest_divisor_leq(n, cap):
    cap = max(1, min(n, cap))
    for d in range(cap, 0, -1):
        if n % d == 0:
            return d
    return 1


# ---------------------------------------------------------------------------
# Single-pass kernel: pool + MLP + scale on a (Bt, C, HW) block.
# ---------------------------------------------------------------------------
def _se_kernel(x_ref, w1_ref, b1_ref, w2_ref, b2_ref, o_ref):
    # Squeeze: global average pool over spatial (f32 accumulation).
    y = jnp.mean(x_ref[...], axis=2, dtype=jnp.float32)               # (Bt, C)
    # Excitation MLP: Linear -> SiLU -> Linear -> Sigmoid (tiny, all f32).
    h = jnp.dot(y, w1_ref[...], preferred_element_type=jnp.float32) + b1_ref[...]
    h = h * jax.nn.sigmoid(h)                                          # SiLU
    s = jnp.dot(h, w2_ref[...], preferred_element_type=jnp.float32) + b2_ref[...]
    s = jax.nn.sigmoid(s).astype(o_ref.dtype)                          # (Bt, C)
    # Scale: re-read x_ref so tiles stream from the pipelined input buffer.
    o_ref[...] = x_ref[...] * s[:, :, None]


# ---------------------------------------------------------------------------
# Streamed two-pass fallback kernels (feature maps too big for one block).
# ---------------------------------------------------------------------------
def _pool_sum_kernel(x_ref, sum_ref, *, hw_total):
    h = pl.program_id(1)

    @pl.when(h == 0)
    def _():
        sum_ref[...] = jnp.zeros_like(sum_ref)

    hw_t = x_ref.shape[-1]
    idx = h * hw_t + jax.lax.broadcasted_iota(jnp.int32, x_ref.shape, 2)
    xv = jnp.where(idx < hw_total, x_ref[...].astype(jnp.float32), 0.0)
    sum_ref[...] += jnp.sum(xv, axis=2)[:, None, :]                    # (1,1,C)


def _scale_kernel(x_ref, gate_ref, o_ref):
    o_ref[...] = x_ref[...] * gate_ref[...].astype(o_ref.dtype)


def _se_layer_streamed(x3, w1, b1, w2, b2, *, hw_t, vmem_limit):
    B, C, HW = x3.shape
    n_hw = pl.cdiv(HW, hw_t)
    itemsize = jnp.dtype(x3.dtype).itemsize

    pool_cost = pl.CostEstimate(
        flops=int(B * C * HW),
        transcendentals=0,
        bytes_accessed=int(B * C * HW * itemsize + B * C * 4),
    )
    sums = pl.pallas_call(
        functools.partial(_pool_sum_kernel, hw_total=HW),
        out_shape=jax.ShapeDtypeStruct((B, 1, C), jnp.float32),
        grid_spec=pltpu.PrefetchScalarGridSpec(
            num_scalar_prefetch=0,
            grid=(B, n_hw),
            in_specs=[pl.BlockSpec((1, C, hw_t), lambda b, h: (b, 0, h))],
            out_specs=pl.BlockSpec((1, 1, C), lambda b, h: (b, 0, 0)),
        ),
        compiler_params=pltpu.CompilerParams(
            dimension_semantics=("parallel", "arbitrary"),
            vmem_limit_bytes=vmem_limit,
        ),
        cost_estimate=pool_cost,
    )(x3)

    # Gate MLP on (B, C): tiny, run in plain JAX (negligible HBM traffic).
    y = sums[:, 0, :] * (1.0 / HW)
    hmid = y @ w1.T.astype(jnp.float32) + b1.astype(jnp.float32)
    hmid = hmid * jax.nn.sigmoid(hmid)
    gate = jax.nn.sigmoid(hmid @ w2.T.astype(jnp.float32) + b2.astype(jnp.float32))
    gate3 = gate.astype(x3.dtype)[:, :, None]                          # (B, C, 1)

    scale_cost = pl.CostEstimate(
        flops=int(B * C * HW),
        transcendentals=0,
        bytes_accessed=int(2 * B * C * HW * itemsize + B * C * itemsize),
    )
    return pl.pallas_call(
        _scale_kernel,
        out_shape=jax.ShapeDtypeStruct((B, C, HW), x3.dtype),
        grid_spec=pltpu.PrefetchScalarGridSpec(
            num_scalar_prefetch=0,
            grid=(B, n_hw),
            in_specs=[pl.BlockSpec((1, C, hw_t), lambda b, h: (b, 0, h)),
                      pl.BlockSpec((1, C, 1), lambda b, h: (b, 0, 0))],
            out_specs=pl.BlockSpec((1, C, hw_t), lambda b, h: (b, 0, h)),
        ),
        compiler_params=pltpu.CompilerParams(
            dimension_semantics=("parallel", "parallel"),
            vmem_limit_bytes=vmem_limit,
        ),
        cost_estimate=scale_cost,
    )(x3, gate3)


# ---------------------------------------------------------------------------
# Wrapper
# ---------------------------------------------------------------------------
def se_layer(x_nchw, w1, b1, w2, b2, *, vmem_block_budget_bytes=None):
    """SELayer forward. x_nchw: (B, C, H, W) -> (B, C, H, W)."""
    B, C, H, W = x_nchw.shape
    HW = H * W
    hidden = w1.shape[0]
    itemsize = jnp.dtype(x_nchw.dtype).itemsize

    # NCHW end-to-end: no wrapper transposes (HBM-bound; each transpose would
    # add a full extra HBM read+write).
    x3 = x_nchw.reshape(B, C, HW)

    # --- Generation-aware VMEM budgets --------------------------------------
    capacity = _vmem_capacity_bytes()
    if capacity <= (64 << 20) + (1 << 20):            # v7x-class: 64 MiB / TC
        default_block_budget = 24 << 20
        limit_cap = max(32 << 20, capacity - (16 << 20))      # ~48 MiB
    else:                                              # v5e / v6e: 128 MiB
        default_block_budget = 80 << 20
        limit_cap = min(capacity - (16 << 20), 112 << 20)
    block_budget = (vmem_block_budget_bytes
                    if vmem_block_budget_bytes is not None
                    else default_block_budget)

    # Padded ((sublane, lane)-tiled) footprint of a single-image (1, C, HW) block.
    sub = _sublane_tile(x_nchw.dtype)
    per_image_padded = _round_up(C, sub) * _round_up(HW, 128) * itemsize

    # Streamed two-pass fallback when even Bt=1 (2 in + 2 out blocks) busts the
    # block budget (e.g. very large feature maps on v7x's 64 MiB VMEM).
    if 4 * per_image_padded > block_budget:
        c_pad = _round_up(C, sub)
        hw_budget = max(1, block_budget // (4 * c_pad * itemsize))
        if HW <= 128:
            hw_t = HW
        else:
            hw_t = max(128, (min(hw_budget, HW) // 128) * 128)
        blk_bytes = c_pad * _round_up(hw_t, 128) * itemsize
        vmem_limit = int(min(limit_cap, max(16 << 20, 4 * blk_bytes + (2 << 20))))
        out = _se_layer_streamed(x3, w1, b1, w2, b2,
                                 hw_t=hw_t, vmem_limit=vmem_limit)
        return out.reshape(B, C, H, W)

    # --- Single-pass path -----------------------------------------------------
    # Batch tile: largest divisor of B that fits the double-buffered block
    # budget and leaves >= 2 grid steps per TensorCore (assume up to 2 cores).
    num_cores = 2  # TODO(synk): query core count from TpuInfo when exposed.
    target_steps = min(B, 2 * num_cores)
    bt_cap = min(max(1, block_budget // (4 * per_image_padded)),
                 max(1, B // target_steps))
    bt = _largest_divisor_leq(B, bt_cap)
    grid = (B // bt,)

    # Pre-transpose weights so the kernel does plain row-major matmuls (tiny).
    w1_t = jnp.transpose(w1)              # (C, hidden)
    w2_t = jnp.transpose(w2)              # (hidden, C)
    b1_2d = b1.reshape(1, hidden)
    b2_2d = b2.reshape(1, C)

    w_itemsize = jnp.dtype(w1.dtype).itemsize
    w_sub = _sublane_tile(w1.dtype)
    weight_bytes = (
        _round_up(C, w_sub) * _round_up(hidden, 128)
        + _round_up(1, w_sub) * _round_up(hidden, 128)
        + _round_up(hidden, w_sub) * _round_up(C, 128)
        + _round_up(1, w_sub) * _round_up(C, 128)
    ) * w_itemsize

    block_bytes = bt * per_image_padded
    # 2x double-buffered input block + 2x output block + weights + headroom,
    # clamped below the generation-aware cap (never the full physical VMEM).
    vmem_limit = int(min(limit_cap,
                         max(16 << 20,
                             4 * block_bytes + 2 * weight_bytes + (2 << 20))))

    cost = pl.CostEstimate(
        flops=int(2 * B * C * HW + 4 * B * C * hidden),
        transcendentals=int(B * (hidden + C)),
        bytes_accessed=int(2 * B * C * HW * itemsize
                           + (w1.size + w2.size + b1.size + b2.size) * w_itemsize),
    )

    out = pl.pallas_call(
        _se_kernel,
        out_shape=jax.ShapeDtypeStruct((B, C, HW), x_nchw.dtype),
        grid_spec=pltpu.PrefetchScalarGridSpec(
            num_scalar_prefetch=0,
            grid=grid,
            in_specs=[
                pl.BlockSpec((bt, C, HW), lambda b: (b, 0, 0)),
                # Weights/biases: grid-invariant and tiny (few KiB padded);
                # default buffering is fine.
                pl.BlockSpec((C, hidden), lambda b: (0, 0)),
                pl.BlockSpec((1, hidden), lambda b: (0, 0)),
                pl.BlockSpec((hidden, C), lambda b: (0, 0)),
                pl.BlockSpec((1, C), lambda b: (0, 0)),
            ],
            out_specs=pl.BlockSpec((bt, C, HW), lambda b: (b, 0, 0)),
        ),
        compiler_params=pltpu.CompilerParams(
            dimension_semantics=("parallel",),
            vmem_limit_bytes=vmem_limit,
        ),
        cost_estimate=cost,
    )(x3, w1_t, b1_2d, w2_t, b2_2d)

    return out.reshape(B, C, H, W)


def _reference(x, w1, b1, w2, b2):
    xf = x.astype(jnp.float32)
    y = jnp.mean(xf, axis=(2, 3))                                      # (B, C)
    h = y @ w1.T + b1
    h = h * jax.nn.sigmoid(h)
    s = jax.nn.sigmoid(h @ w2.T + b2)
    return (xf * s[:, :, None, None]).astype(x.dtype)


if __name__ == "__main__":
    # SELayer(inp=8, oup=8, reduction=4) -> hidden = _make_divisible(8//4, 8) = 8
    inp = oup = C = 8
    reduction = 4
    hidden = _make_divisible(inp // reduction, 8)

    B, H, W = 2, 16, 16

    key = jax.random.PRNGKey(0)
    kx, k1, k2, k3, k4 = jax.random.split(key, 5)

    x = jax.random.normal(kx, (B, C, H, W), dtype=jnp.float32)

    # Deterministic init mimicking nn.Linear's uniform(-1/sqrt(fan_in), ...)
    lim1 = 1.0 / math.sqrt(oup)
    w1 = jax.random.uniform(k1, (hidden, oup), minval=-lim1, maxval=lim1,
                            dtype=jnp.float32)
    b1 = jax.random.uniform(k2, (hidden,), minval=-lim1, maxval=lim1,
                            dtype=jnp.float32)
    lim2 = 1.0 / math.sqrt(hidden)
    w2 = jax.random.uniform(k3, (oup, hidden), minval=-lim2, maxval=lim2,
                            dtype=jnp.float32)
    b2 = jax.random.uniform(k4, (oup,), minval=-lim2, maxval=lim2,
                            dtype=jnp.float32)

    ref = _reference(x, w1, b1, w2, b2)

    # 1) Default single-pass path.
    out = se_layer(x, w1, b1, w2, b2)
    out = jax.block_until_ready(out)
    assert out.shape == (B, C, H, W)
    assert jnp.allclose(out, ref, atol=1e-5, rtol=1e-5), "single-pass mismatch"

    # 2) Force the streamed two-pass fallback with a tiny block budget and
    #    check it produces the same result.
    out2 = se_layer(x, w1, b1, w2, b2, vmem_block_budget_bytes=16 * 1024)
    out2 = jax.block_until_ready(out2)
    assert jnp.allclose(out2, ref, atol=1e-5, rtol=1e-5), "streamed mismatch"

    print("KERNEL_OK")
</pallas_src>

<mosaic_0001>
module attributes {stable_mosaic.version = 11 : i64} {
  func.func @_se_kernel(%arg0: i32, %arg1: memref<1x8x256xf32, #tpu.memory_space<vmem>>, %arg2: memref<8x8xf32, #tpu.memory_space<vmem>>, %arg3: memref<1x8xf32, #tpu.memory_space<vmem>>, %arg4: memref<8x8xf32, #tpu.memory_space<vmem>>, %arg5: memref<1x8xf32, #tpu.memory_space<vmem>>, %arg6: memref<1x8x256xf32, #tpu.memory_space<vmem>>) attributes {dimension_semantics = [#tpu.dimension_semantics<parallel>], iteration_bounds = array<i64: 2>, scalar_prefetch = 0 : i64, scratch_operands = 0 : i64, tpu.core_type = #tpu.core_type<tc>, window_params = [{transform_indices = @transform_0, window_bounds = array<i64: 1, 8, 256>}, {pipeline_mode = #tpu.pipeline_mode<synchronous>, transform_indices = @transform_1, window_bounds = array<i64: 8, 8>}, {pipeline_mode = #tpu.pipeline_mode<synchronous>, transform_indices = @transform_2, window_bounds = array<i64: 1, 8>}, {pipeline_mode = #tpu.pipeline_mode<synchronous>, transform_indices = @transform_3, window_bounds = array<i64: 8, 8>}, {pipeline_mode = #tpu.pipeline_mode<synchronous>, transform_indices = @transform_4, window_bounds = array<i64: 1, 8>}, {transform_indices = @transform_5, window_bounds = array<i64: 1, 8, 256>}]} {
    %c0 = arith.constant 0 : index
    %c0_0 = arith.constant 0 : index
    %c0_1 = arith.constant 0 : index
    %0 = vector.load %arg1[%c0, %c0_0, %c0_1] : memref<1x8x256xf32, #tpu.memory_space<vmem>>, vector<1x8x256xf32>
    %cst = arith.constant dense<0.000000e+00> : vector<1x8xf32>
    %1 = vector.multi_reduction <add>, %0, %cst [2] : vector<1x8x256xf32> to vector<1x8xf32>
    %cst_2 = arith.constant 2.560000e+02 : f32
    %2 = vector.broadcast %cst_2 : f32 to vector<1x8xf32>
    %3 = arith.divf %1, %2 : vector<1x8xf32>
    %c0_3 = arith.constant 0 : index
    %c0_4 = arith.constant 0 : index
    %4 = vector.load %arg2[%c0_3, %c0_4] : memref<8x8xf32, #tpu.memory_space<vmem>>, vector<8x8xf32>
    %cst_5 = arith.constant dense<0.000000e+00> : vector<1x8xf32>
    %5 = tpu.matmul %3, %4, %cst_5 {dimension_numbers = #tpu.dot_dimension_numbers<[1], [0], [0], [1], [0, 0, 1, 1], [], []>} : vector<1x8xf32>, vector<8x8xf32>, vector<1x8xf32> -> vector<1x8xf32>
    %c0_6 = arith.constant 0 : index
    %c0_7 = arith.constant 0 : index
    %6 = vector.load %arg3[%c0_6, %c0_7] : memref<1x8xf32, #tpu.memory_space<vmem>>, vector<1x8xf32>
    %7 = arith.addf %5, %6 : vector<1x8xf32>
    %8 = arith.negf %7 : vector<1x8xf32>
    %9 = math.exp %8 : vector<1x8xf32>
    %cst_8 = arith.constant 1.000000e+00 : f32
    %10 = vector.broadcast %cst_8 : f32 to vector<1x8xf32>
    %11 = arith.addf %10, %9 : vector<1x8xf32>
    %12 = arith.divf %10, %11 : vector<1x8xf32>
    %13 = arith.mulf %7, %12 : vector<1x8xf32>
    %c0_9 = arith.constant 0 : index
    %c0_10 = arith.constant 0 : index
    %14 = vector.load %arg4[%c0_9, %c0_10] : memref<8x8xf32, #tpu.memory_space<vmem>>, vector<8x8xf32>
    %cst_11 = arith.constant dense<0.000000e+00> : vector<1x8xf32>
    %15 = tpu.matmul %13, %14, %cst_11 {dimension_numbers = #tpu.dot_dimension_numbers<[1], [0], [0], [1], [0, 0, 1, 1], [], []>} : vector<1x8xf32>, vector<8x8xf32>, vector<1x8xf32> -> vector<1x8xf32>
    %c0_12 = arith.constant 0 : index
    %c0_13 = arith.constant 0 : index
    %16 = vector.load %arg5[%c0_12, %c0_13] : memref<1x8xf32, #tpu.memory_space<vmem>>, vector<1x8xf32>
    %17 = arith.addf %15, %16 : vector<1x8xf32>
    %18 = arith.negf %17 : vector<1x8xf32>
    %19 = math.exp %18 : vector<1x8xf32>
    %cst_14 = arith.constant 1.000000e+00 : f32
    %20 = vector.broadcast %cst_14 : f32 to vector<1x8xf32>
    %21 = arith.addf %20, %19 : vector<1x8xf32>
    %22 = arith.divf %20, %21 : vector<1x8xf32>
    %c0_15 = arith.constant 0 : index
    %c0_16 = arith.constant 0 : index
    %c0_17 = arith.constant 0 : index
    %23 = vector.load %arg1[%c0_15, %c0_16, %c0_17] : memref<1x8x256xf32, #tpu.memory_space<vmem>>, vector<1x8x256xf32>
    %24 = vector.shape_cast %22 : vector<1x8xf32> to vector<1x8x1xf32>
    %25 = vector.broadcast %24 : vector<1x8x1xf32> to vector<1x8x256xf32>
    %26 = arith.mulf %23, %25 : vector<1x8x256xf32>
    %c0_18 = arith.constant 0 : index
    %c0_19 = arith.constant 0 : index
    %c0_20 = arith.constant 0 : index
    %27 = vector.load %arg6[%c0_18, %c0_19, %c0_20] : memref<1x8x256xf32, #tpu.memory_space<vmem>>, vector<1x8x256xf32>
    tpu.vector_store %arg6[%c0_18, %c0_19, %c0_20], %26 {strides = array<i32>} : memref<1x8x256xf32, #tpu.memory_space<vmem>>, vector<1x8x256xf32>,
    return
  }
  func.func @transform_0(%arg0: i32) -> (i32, i32, i32) {
    %c0_i32 = arith.constant 0 : i32
    %c0_i32_0 = arith.constant 0 : i32
    %c0_i32_1 = arith.constant 0 : i32
    return %arg0, %c0_i32, %c0_i32_0 : i32, i32, i32
  }
  func.func @transform_1(%arg0: i32) -> (i32, i32) {
    %c0_i32 = arith.constant 0 : i32
    %c0_i32_0 = arith.constant 0 : i32
    %c0_i32_1 = arith.constant 0 : i32
    return %c0_i32, %c0_i32_0 : i32, i32
  }
  func.func @transform_2(%arg0: i32) -> (i32, i32) {
    %c0_i32 = arith.constant 0 : i32
    %c0_i32_0 = arith.constant 0 : i32
    %c0_i32_1 = arith.constant 0 : i32
    return %c0_i32, %c0_i32_0 : i32, i32
  }
  func.func @transform_3(%arg0: i32) -> (i32, i32) {
    %c0_i32 = arith.constant 0 : i32
    %c0_i32_0 = arith.constant 0 : i32
    %c0_i32_1 = arith.constant 0 : i32
    return %c0_i32, %c0_i32_0 : i32, i32
  }
  func.func @transform_4(%arg0: i32) -> (i32, i32) {
    %c0_i32 = arith.constant 0 : i32
    %c0_i32_0 = arith.constant 0 : i32
    %c0_i32_1 = arith.constant 0 : i32
    return %c0_i32, %c0_i32_0 : i32, i32
  }
  func.func @transform_5(%arg0: i32) -> (i32, i32, i32) {
    %c0_i32 = arith.constant 0 : i32
    %c0_i32_0 = arith.constant 0 : i32
    %c0_i32_1 = arith.constant 0 : i32
    return %arg0, %c0_i32, %c0_i32_0 : i32, i32, i32
  }
}

</mosaic_0001>

<bundles_post_ra>
// kernel: tpu_custom_call.1
= control target key start
LH: loop header
LB: loop body
LE: loop exit
PB: predicated region body
PF: predicated region fallthrough
CT: control target
= control target key end

     0   :  { %10 = vsyncpa [#allocation3], 0  ;;  %s954_s0 = inlined_call_operand.hbm [shape: f32[2,8,256], index: 0, kind: input, shape index: {}]   ;;  %s955_s1 = inlined_call_operand.hbm [shape: f32[8,8], index: 1, kind: input, shape index: {}]   ;;  %s956_s2 = inlined_call_operand.vmem [shape: f32[1,8], index: 2, kind: input, shape index: {}]   ;;  %s957_s3 = inlined_call_operand.hbm [shape: f32[8,8], index: 3, kind: input, shape index: {}]   ;;  %s958_s4 = inlined_call_operand.vmem [shape: f32[1,8], index: 4, kind: input, shape index: {}]   ;;  %s959_s5 = inlined_call_operand.hbm [shape: f32[2,8,256], index: 5, kind: output, shape index: {}]  }
   0x1   :  { %12 = vsyncpa [#allocation3 + $0x1], 0 }
   0x2   :  { %13 = vsyncpa [#allocation6], 0 }
   0x3   :  { %14 = vsyncpa [#allocation4], 0 }
   0x4   :  { %16 = vsyncpa [#allocation4 + $0x1], 0  ;;  %s793_s18 = smov 0   ;;  %s795_s19 = smov 0  }
   0x5   :  { %s797_s20 = smov 0   ;;  %s799_s21 = smov 0  }
   0x6 LB: > { %s814_s22 = sadd.s32 4294967295, %s758_s21   ;;  %s495_s23 = sadd.s32 4294967294, %s758_s21   ;;  %s758_s21 = sphi %s799_s21, %s969_s21   ;;  %s754_s20 = sphi %s797_s20, %s968_s20   ;;  %s750_s19 = sphi %s795_s19, %s967_s19   ;;  %s746_s18 = sphi %s793_s18, %s966_s18  }
   0x7   : > { %p42_p0 = scmp.ne.s32.totalorder %s750_s19, %s746_s18  ;;  %p43_p1 = scmp.eq.s32.totalorder %s814_s22, 0 }
   0x8   : > { %p150_p2 = scmp.eq.s32.totalorder %s814_s22, 1  ;;  %p156_p3 = scmp.eq.s32.totalorder %s495_s23, 1 }
   0x9   : > { %p823_p4 = por %p43_p1, %p42_p0  ;;  %p496_p5 = scmp.ge.s32.totalorder %s758_s21, 1 }
   0xa   : > { %p828_p6 = por %p156_p3, %p42_p0  ;;  %p163_p7 = scmp.lt.s32.totalorder %s758_s21, 3 }
   0xb   : > { %s175_s28 = sshll.u32 %s955_s1, 4  ;;  %s760_s30 = smov [#allocation5]   ;;  %s176_s28 = int_to_ptr.hbm [resolvable:$true] %s175_s28 }
   0xc   : > { %p836_p8 = pnand %p496_p5, %p163_p7  ;;  %s177_s6 = sshll.u32 %s760_s30, 4  ;;  %s178_s6 = int_to_ptr.vmem [resolvable:$true] %s177_s6 }
   0xd   : > { %s190_s9 = sshll.u32 %s957_s3, 4  ;;  %s761_s10 = smov [#allocation7]   ;;  %s191_s9 = int_to_ptr.hbm [resolvable:$true] %s190_s9 }
   0xe   : > { %p531_p10 = pneg %p836_p8  ;;  %s192_s11 = sshll.u32 %s761_s10, 4  ;;  %s193_s11 = int_to_ptr.vmem [resolvable:$true] %s192_s11 }
   0xf   : > { %s849_s12 = sadd.s32 1, %s758_s21   ;;  %s29_s13 = sadd.s32 1, %s754_s20 }
  0x10   : > { %p532_p11 = pnand %p531_p10, %p43_p1  ;;  %s26_s14 = ssub.s32 %s758_s21, %s849_s12 }
  0x11   : > { %p36_p12 = scmp.ne.s32.totalorder %s754_s20, %s750_s19  ;;  %p27_p13 = scmp.eq.s32.totalorder %s26_s14, 0 }
  0x12   : > { %534 = dma.hbm_to_vmem [thread:$0]  (!%p532_p11), %s176_s28, 128, %s178_s6, [#allocation6]  }
  0x13   : > { %537 = dma.hbm_to_vmem [thread:$0]  (!%p532_p11), %s191_s9, 128, %s193_s11, [#allocation6]  }
  0x14   : > { %p37_p0 = scmp.eq.s32.totalorder %s758_s21, 0  ;;  %p859_p3 = por %p150_p2, %p36_p12 }
  0x15   : > { %p548_p5 = scmp.lt.s32.totalorder %s758_s21, 2  ;;  %s206_s17 = sand.u32 1, %s754_s20  }
  0x16   : > { %s865_s16 = scalar_select %p27_p13, %s754_s20, %s29_s13  }
  0x17   : > { %p38_p7 = por %p37_p0, %p36_p12  ;;  %s500_s23 = sshll.u32 %s206_s17, 4 }
  0x18   : > { %s517_s26 = sshll.u32 %s758_s21, 4  ;;  %s210_s6 = scalar_lea.vmem [#allocation2], %s500_s23 }
  0x19   : > { %s215_s30 = scalar_lea.hbm %s954_s0, %s517_s26  ;;  %s219_s7 = sshll.u32 %s210_s6, 4  ;;  %s220_s7 = int_to_ptr.vmem [resolvable:$true] %s219_s7 }
  0x1a   : > { %s217_s8 = sshll.u32 %s215_s30, 4  ;;  %p872_p2 = pnand %p548_p5, %p38_p7  ;;  %s218_s8 = int_to_ptr.hbm [resolvable:$true] %s217_s8 }
  0x1b   : > { %s207_s10 = scalar_lea.sflag [#allocation3], %s206_s17  ;;  %s658_s11 = sshra.s32 %s218_s8, 4  ;;  %s659_s11 = int_to_ptr.hbm [resolvable:$true] %s658_s11 }
  0x1c   : > { %s660_s13 = scalar_lea.hbm %s659_s11, 16  ;;  %p662_p11 = pneg %p872_p2 }
  0x1d   : > { %p661_p10 = scmp.ne.s32.totalorder %s659_s11, %s660_s13  ;;  %s665_s26 = scalar_lea.hbm %s954_s0, 32 }
  0x1e   : > { %p666_p0 = scmp.lt.s32.totalorder %s659_s11, %s954_s0  ;;  %p667_p5 = scmp.lt.s32.totalorder %s665_s26, %s660_s13 }
  0x1f   : > { %p663_p12 = pnand %p662_p11, %p661_p10 }
  0x20   : > { %p668_p7 = por %p667_p5, %p666_p0 }
  0x21   : > { %p664_p13 = pneg %p663_p12 }
  0x23   : > { %p669_p9 = pnand %p668_p7, %p664_p13 }
  0x25   : > { %672 = shalt.err (!%p669_p9)
}
  0x26   : > { %541 = dma.hbm_to_vmem [thread:$0]  (!%p872_p2), %s218_s8, 256, %s220_s7, %s207_s10  }
  0x27   : > { %228 = sbr.rel (%p836_p8) target bundleno = 607 (0x25f), region = 40  ;;  %s889_s17 = sand.u32 (!%p836_p8), 1, %s750_s19  }
  0x28   : > { %s504_s30 = sshll.u32 (!%p836_p8), %s889_s17, 4  ;;  %s231_s6 = scalar_lea.sflag (!%p836_p8), [#allocation3], %s889_s17 }
  0x29   : > { %s234_s11 = scalar_lea.vmem (!%p836_p8), [#allocation2], %s504_s30 }
  0x2c   : > { %733 = dma.done.wait (%p823_p4), %s231_s6, 256  }
  0x2d   : > { %735 = vsyncadd (%p823_p4), %s231_s6, 4294967040 }
  0x2e   : > { %737 = dma.done.wait (%p43_p1), [#allocation6], 256  }
  0x2f   : > { %739 = vsyncadd (%p43_p1), [#allocation6], 4294967040  ;;  %v903_v0 = vld [vmem:[%s234_s11] sm:$0xff]  ;;  %v905_v1 = vld [vmem:[%s234_s11 + $0x8] sm:$0xff]  ;;  %v762_v4 = vmov 256.0   ;;  %v288_v10 = vlaneseq  ;;  %vm291_vm1 = vcmask 64512  }
  0x30   : > { %v274_v2 = vadd.f32 %v905_v1, %v903_v0  ;;  %v285_v3 = vld [vmem:[#allocation5] sm:$0xff]  ;;  %588 = vrcp.f32 %v762_v4  ;;  %v334_v17 = vld [vmem:[#allocation7] sm:$0xff]  ;;  %s518_s9 = sshll.u32 %s814_s22, 4  ;;  %s271_s23 = scalar_lea.vmem [#allocation8], %s504_s30 }
  0x31   : > { %309 = vmatpush.msra.mxu0 %v285_v3  ;;  %v289_v12 = vand.u32 127, %v288_v10  ;;  %v286_v16 = vld [vmem:[%s956_s2] sm:$0x1]  ;;  %354 = vmatpush.msra.mxu1 %v334_v17  ;;  %v380_v34 = vshrl.u32 %v288_v10, 7  ;;  %s401_s14 = scalar_lea.hbm %s959_s5, %s518_s9  ;;  %s403_s26 = sshll.u32 %s271_s23, 4  ;;  %s404_s26 = int_to_ptr.vmem [resolvable:$true] %s403_s26 }
  0x32   : > { %275 = vadd.xlane.f32.xlu0 %v274_v2  ;;  %v335_v35 = vld [vmem:[%s958_s4] sm:$0x1]  ;;  %s405_s27 = sshll.u32 %s401_s14, 4  ;;  %s390_s28 = scalar_lea.sflag [#allocation4], %s889_s17  ;;  %s406_s27 = int_to_ptr.hbm [resolvable:$true] %s405_s27 }
  0x33   : > { %587 = vset.pattern.permute.xlu0 %v380_v34  ;;  %s702_s22 = sshra.s32 %s406_s27, 4  ;;  %s708_s24 = scalar_lea.hbm %s959_s5, 32  ;;  %s703_s22 = int_to_ptr.hbm [resolvable:$true] %s702_s22 }
  0x34   : > { %s704_s6 = scalar_lea.hbm %s703_s22, 16  ;;  %p709_p9 = scmp.lt.s32.totalorder %s703_s22, %s959_s5 }
  0x35   : > { %p705_p1 = scmp.ne.s32.totalorder %s703_s22, %s704_s6  ;;  %p710_p2 = scmp.lt.s32.totalorder %s708_s24, %s704_s6 }
  0x36   : > { %v589_v5 = vpop.eup %588 }
  0x37   : > { %v278_v6 = vmul.f32 256.0, %v589_v5  ;;  %vm282_vm0 = vweird.f32 %v589_v5  ;;  %p706_p4 = pnand %p705_p1, %p859_p3  ;;  %p711_p10 = por %p710_p2, %p709_p9 }
  0x39   : > { %v279_v7 = vsub.f32 1.0, %v278_v6  ;;  %p707_p8 = pneg %p706_p4 }
  0x3b   : > { %v280_v8 = vmul.f32 %v589_v5, %v279_v7  ;;  %p712_p11 = pnand %p711_p10, %p707_p8 }
  0x3d   : > { %v281_v9 = vadd.f32 %v589_v5, %v280_v8 }
  0x3f   : > { %v283_v11 = vsel %vm282_vm0, %v589_v5, %v281_v9 }
  0xa5   : > { %v276_v13 = vpop.xlane.xlu0 %275 }
  0xa6   : > { %v284_v14 = vmul.f32 %v283_v11, %v276_v13 }
  0xa8   : > { %v290_v15 = vperm.slane %v284_v14, %v289_v12 }
  0xaa   : > { %508 = vmatmul.msk.f32.vlgmr.msra.gmra.mxu0 %vm291_vm1, %v290_v15 }
 0x127   : > { %v311_v18 = vpop.f32.mrf.mxu0 }
 0x128   : > { %v312_v19 = vadd.f32 %v311_v18, %v286_v16 }
 0x12a   : > { %v509_v20 = vmul.f32 -1.442695, %v312_v19 }
 0x12c   : > { %590 = vpow2.f32 %v509_v20 }
 0x132   : > { %v591_v21 = vpop.eup %590 }
 0x133   : > { %v317_v22 = vadd.f32 1.0, %v591_v21 }
 0x135   : > { %592 = vrcp.f32 %v317_v22  ;;  %v329_v26 = vand.u32 2147483648, %v317_v22  ;;  %v327_v28 = vand.u32 2147483647, %v317_v22  ;;  %vm323_vm3 = vweird.f32 %v317_v22 }
 0x137   : > { %v330_v30 = vor.u32 1.1754944e-38, %v329_v26  ;;  %vm328_vm5 = vcmp.eq.f32.partialorder %v327_v28, 8.507059e+37 }
 0x13b   : > { %v593_v23 = vpop.eup %592 }
 0x13c   : > { %v319_v24 = vmul.f32 %v593_v23, %v317_v22  ;;  %vm324_vm2 = vweird.f32 %v593_v23 }
 0x13d   : > { %vm325_vm4 = vmor %vm323_vm3, %vm324_vm2 }
 0x13e   : > { %v320_v25 = vsub.f32 1.0, %v319_v24 }
 0x140   : > { %v321_v27 = vmul.f32 %v593_v23, %v320_v25 }
 0x142   : > { %v322_v29 = vadd.f32 %v593_v23, %v321_v27 }
 0x144   : > { %v326_v31 = vsel %vm325_vm4, %v593_v23, %v322_v29 }
 0x145   : > { %v331_v32 = vsel %vm328_vm5, %v330_v30, %v326_v31 }
 0x146   : > { %v333_v33 = vmul.f32 %v331_v32, %v312_v19 }
 0x148   : > { %510 = vmatmul.msk.f32.vlgmr.msra.gmra.mxu1 %vm291_vm1, %v333_v33 }
 0x1c5   : > { %v356_v36 = vpop.f32.mrf.mxu1 }
 0x1c6   : > { %v357_v37 = vadd.f32 %v356_v36, %v335_v35 }
 0x1c8   : > { %v511_v38 = vmul.f32 -1.442695, %v357_v37 }
 0x1ca   : > { %594 = vpow2.f32 %v511_v38 }
 0x1d0   : > { %v595_v39 = vpop.eup %594 }
 0x1d1   : > { %v362_v40 = vadd.f32 1.0, %v595_v39 }
 0x1d3   : > { %596 = vrcp.f32 %v362_v40  ;;  %v374_v44 = vand.u32 2147483648, %v362_v40  ;;  %v372_v46 = vand.u32 2147483647, %v362_v40  ;;  %vm368_vm7 = vweird.f32 %v362_v40 }
 0x1d5   : > { %v375_v48 = vor.u32 1.1754944e-38, %v374_v44  ;;  %vm373_vm9 = vcmp.eq.f32.partialorder %v372_v46, 8.507059e+37 }
 0x1d9   : > { %v597_v41 = vpop.eup %596 }
 0x1da   : > { %v364_v42 = vmul.f32 %v597_v41, %v362_v40  ;;  %vm369_vm6 = vweird.f32 %v597_v41 }
 0x1db   : > { %vm370_vm8 = vmor %vm368_vm7, %vm369_vm6 }
 0x1dc   : > { %v365_v43 = vsub.f32 1.0, %v364_v42 }
 0x1de   : > { %v366_v45 = vmul.f32 %v597_v41, %v365_v43 }
 0x1e0   : > { %v367_v47 = vadd.f32 %v597_v41, %v366_v45 }
 0x1e2   : > { %v371_v49 = vsel %vm370_vm8, %v597_v41, %v367_v47 }
 0x1e3   : > { %v376_v50 = vsel %vm373_vm9, %v375_v48, %v371_v49 }
 0x1e4   : > { %v378_v51 = vperm.slane %v376_v50, 0 }
 0x1e6   : > { %383 = vperm.xlu0 %587, %v378_v51  }
 0x258   : > { %v384_v52 = vpop.permute.xlu0 %383 }
 0x259   : > { %v385_v53 = vmul.f32 %v384_v52, %v903_v0  ;;  %v386_v54 = vmul.f32 %v384_v52, %v905_v1 }
 0x25b   : > { %387 = vst [vmem:[%s271_s23] sm:$0xff] %v385_v53 }
 0x25c   : > { %388 = vst [vmem:[%s271_s23 + $0x8] sm:$0xff] %v386_v54 }
 0x25d   : > { %715 = shalt.err (!%p712_p11)
}
 0x25e   : > { %529 = dma.vmem_to_hbm [thread:$0]  (%p859_p3), %s404_s26, 256, %s406_s27, %s390_s28  }
 0x25f PF: > { %s417_s17 = sand.u32 1, %s746_s18   ;;  %p965_p12 = scmp.ge.s32.totalorder %s758_s21, 2 }
 0x260   : > { %s418_s8 = scalar_lea.sflag [#allocation4], %s417_s17 }
 0x261   : > { %p543_p13 = pnand %p965_p12, %p828_p6 }
 0x263   : > { %p544_p0 = pneg %p543_p13 }
 0x265   : > { %741 = dma.done.wait (%p544_p0), %s418_s8, 256  }
 0x266   : > { %743 = vsyncadd (%p544_p0), %s418_s8, 4294967040  ;;  %p19_p5 = scmp.ge.s32.totalorder %s849_s12, 4   ;;  %s966_s18 = smov %s750_s19 }
 0x267   : > { %s967_s19 = smov %s754_s20  ;;  %s968_s20 = smov %s865_s16 }
 0x268   : > { %s969_s21 = smov %s849_s12  ;;  %21 = sbr.rel (!%p19_p5) target bundleno = 6 (0x6), region = 93 }
 0x26d   :  { %424 = vsyncpa [#allocation3], 1 }
 0x26e   :  { %426 = vsyncpa [#allocation3 + $0x1], 1 }
 0x26f   :  { %427 = vsyncpa [#allocation6], 1 }
 0x270   :  { %428 = vsyncpa [#allocation4], 1 }
 0x271   :  { %430 = vsyncpa [#allocation4 + $0x1], 1 }

</bundles_post_ra>
